<compile_context>
chip_gen: v6e
topology: v6e:2x2x1
jax: 0.10.0
libtpu: 0.0.40
codegen_flags: <defaults>
</compile_context>

<pallas_src>
import jax
import jax.numpy as jnp
from jax.experimental import pallas as pl
from jax.experimental.pallas import tpu as pltpu


def _make_kernel(valid_k):
    def kernel(v_ref, qp_ref, wv_ref, bv_ref, out_ref):
        TB, Kp, VD = v_ref.shape
        H = wv_ref.shape[1]

        # One big bf16 MXU matmul over all TB*Kp rows of this tile (FCNet v projection).
        # Kp % 8 == 0, so the (TB, Kp) -> TB*Kp sublane merge is layout-free.
        v2 = v_ref[...].reshape(TB * Kp, VD)
        v_proj = jnp.dot(v2, wv_ref[...], preferred_element_type=jnp.float32)
        v_proj = jnp.maximum(v_proj + bv_ref[...], 0.0).reshape(TB, Kp, H)  # f32

        # q projection precomputed in the wrapper (already scaled by the width-1
        # weight-norm Linear row wl); broadcast over the K axis and reduce over H
        # on the VPU/XLU — keeps the MXU free and yields lane-dense (TB, Kp) logits.
        # bl was dropped: a scalar added uniformly across K is softmax-invariant.
        # TODO(synk): training-mode dropout not implemented (eval-mode identity).
        logits = jnp.sum(v_proj * qp_ref[...][:, None, :], axis=-1)          # (TB, Kp)

        if Kp != valid_k:
            col = jax.lax.broadcasted_iota(jnp.int32, (TB, Kp), 1)
            logits = jnp.where(col < valid_k, logits, -1e30)

        # softmax over the K (lane) axis — dim=1 of the module's [B, K, 1] logits.
        m = jnp.max(logits, axis=-1, keepdims=True)                          # (TB, 1)
        e = jnp.exp(logits - m)
        s = jnp.sum(e, axis=-1, keepdims=True)
        out_ref[...] = e * pl.reciprocal(s, approx=True)

    return kernel


def _vmem_capacity_bytes():
    # Trace-time hardware query; fall back to the smallest physical VMEM across
    # supported generations (v7x: 64 MiB) if the query is unavailable.
    try:
        return int(pltpu.get_tpu_info().vmem_capacity_bytes)
    except Exception:
        return 64 * 1024 * 1024


def _pick_tb(B, Kp, VD, H, budget_bytes):
    """Largest VMEM-fitting batch tile; prefers >=2 grid steps for dual-TC chips."""

    def vmem_bytes(tb):
        v_bytes = 2 * tb * Kp * VD * 2      # bf16 v tile, double-buffered
        qp_bytes = 2 * tb * H * 4           # f32 scaled q_proj tile, double-buffered
        out_bytes = 2 * tb * Kp * 4         # f32 output tile, double-buffered
        wv_bytes = VD * H * 2               # bf16 weight, single-buffered
        bv_bytes = 2 * H * 4                # f32 bias, double-buffered
        return v_bytes + qp_bytes + out_bytes + wv_bytes + bv_bytes

    # (8,128) rule on the (TB, Kp)/(TB, H) blocks: TB % 8 == 0 or TB == B.
    candidates = [tb for tb in range(1, B + 1)
                  if B % tb == 0 and (tb % 8 == 0 or tb == B)]
    fitting = [tb for tb in candidates if vmem_bytes(tb) <= budget_bytes]
    pool = fitting if fitting else candidates
    # Keep >= 2 grid steps when the batch allows it so both TensorCores of a
    # dual-TC chip (v7x) get work under dimension_semantics=("parallel",).
    multi = [tb for tb in pool if B // tb >= 2]
    if B >= 16 and multi:
        return max(multi)
    return max(pool)


def _build_call(B, Kp, VD, H, TB, valid_k, vmem_limit, single_buffer_wv):
    wv_kwargs = {}
    if single_buffer_wv:
        # Constant-index weight is only ever fetched once; single-buffer it to free
        # VMEM for a larger activation tile.
        wv_kwargs["pipeline_mode"] = pl.Buffered(1)

    grid_spec = pltpu.PrefetchScalarGridSpec(
        num_scalar_prefetch=0,
        grid=(B // TB,),
        in_specs=[
            pl.BlockSpec((TB, Kp, VD), lambda b: (b, 0, 0)),        # v (bf16)
            pl.BlockSpec((TB, H), lambda b: (b, 0)),                # q_proj * wl (f32)
            pl.BlockSpec((VD, H), lambda b: (0, 0), **wv_kwargs),   # Wv_eff (bf16)
            pl.BlockSpec((1, H), lambda b: (0, 0)),                 # bv (f32)
        ],
        out_specs=pl.BlockSpec((TB, Kp), lambda b: (b, 0)),         # lane-dense output
    )
    return pl.pallas_call(
        _make_kernel(valid_k),
        out_shape=jax.ShapeDtypeStruct((B, Kp), jnp.float32),
        grid_spec=grid_spec,
        compiler_params=pltpu.CompilerParams(
            dimension_semantics=("parallel",),
            vmem_limit_bytes=vmem_limit,
        ),
    )


def new_attention(v, q, wv, bv, wq, bq, wl, bl):
    B, K, VD = v.shape
    H = wv.shape[1]

    # Pad K to a multiple of 8 so the in-kernel (TB,K)->TB*K merge is layout-free;
    # padded logits are masked to -inf-equivalent before the softmax.
    Kp = ((K + 7) // 8) * 8
    if Kp != K:
        v = jnp.pad(v, ((0, 0), (0, Kp - K), (0, 0)))

    # bf16 MXU operands; everything downstream of the matmul stays f32.
    v_bf = v.astype(jnp.bfloat16)
    wv_bf = wv.astype(jnp.bfloat16)

    # Hoisted q projection: one batched (B, QD) @ (QD, H) XLA matmul + ReLU, with the
    # width-1 weight-norm Linear row wl folded in (elementwise, logits unchanged).
    # bl is dropped entirely: scalar bias over the K axis is softmax-invariant.
    q_proj = jnp.maximum(q @ wq + bq, 0.0)
    qp_scaled = (q_proj * wl.reshape(1, H)).astype(jnp.float32)     # (B, H)

    bv2 = bv.reshape(1, H).astype(jnp.float32)

    vmem_cap = _vmem_capacity_bytes()
    TB = _pick_tb(B, Kp, VD, H, budget_bytes=int(vmem_cap * 0.70))
    vmem_limit = int(vmem_cap * 0.85)

    args = (v_bf, qp_scaled, wv_bf, bv2)
    try:
        out = _build_call(B, Kp, VD, H, TB, K, vmem_limit, single_buffer_wv=True)(*args)
    except Exception:
        # Older JAX without BlockSpec pipeline_mode / Buffered(1): default buffering.
        out = _build_call(B, Kp, VD, H, TB, K, vmem_limit, single_buffer_wv=False)(*args)

    # Match the PyTorch module's [B, K, 1] softmax output.
    return out[:, :K].reshape(B, K, 1)


def _weight_norm_eff(w, g):
    # weight_norm with dim=None: W_eff = g * W / ||W||_F
    return g * w / jnp.sqrt(jnp.sum(w * w))


def _reference(v, q, wv, bv, wq, bq, wl, bl):
    v_proj = jnp.maximum(jnp.einsum("bkd,dh->bkh", v, wv) + bv, 0.0)
    q_proj = jnp.maximum(q @ wq + bq, 0.0)[:, None, :]
    joint = v_proj * q_proj
    logits = jnp.einsum("bkh,ho->bko", joint, wl) + bl
    return jax.nn.softmax(logits, axis=1)


if __name__ == "__main__":
    # Small shapes consistent with the module.  K=10 deliberately exercises the
    # pad-to-multiple-of-8 + masked-softmax path.
    # NOTE: self.linear = Linear(q_dim, 1) is applied to the num_hid-wide joint
    # representation, so (as in the original code) this requires num_hid == q_dim.
    B, K, V_DIM, Q_DIM, NUM_HID = 2, 10, 16, 32, 32

    key = jax.random.PRNGKey(0)
    kv, kq, k1, k2, k3, k4, k5, k6 = jax.random.split(key, 8)

    v = jax.random.normal(kv, (B, K, V_DIM), dtype=jnp.float32)
    q = jax.random.normal(kq, (B, Q_DIM), dtype=jnp.float32)

    # Deterministic parameter init (PyTorch Linear-style uniform), stored as (in, out).
    def lin_init(kw, kb, fan_in, fan_out):
        bound = 1.0 / jnp.sqrt(fan_in)
        w = jax.random.uniform(kw, (fan_in, fan_out), jnp.float32, -bound, bound)
        b = jax.random.uniform(kb, (fan_out,), jnp.float32, -bound, bound)
        return w, b

    wv_raw, bv = lin_init(k1, k2, V_DIM, NUM_HID)
    wq_raw, bq = lin_init(k3, k4, Q_DIM, NUM_HID)
    wl_raw, bl = lin_init(k5, k6, NUM_HID, 1)

    # weight_norm(dim=None) effective weights (g initialized to ||W||_F, as PyTorch does).
    wv = _weight_norm_eff(wv_raw, jnp.sqrt(jnp.sum(wv_raw * wv_raw)))
    wq = _weight_norm_eff(wq_raw, jnp.sqrt(jnp.sum(wq_raw * wq_raw)))
    wl = _weight_norm_eff(wl_raw, jnp.sqrt(jnp.sum(wl_raw * wl_raw)))

    out = new_attention(v, q, wv, bv, wq, bq, wl, bl)
    out = jax.block_until_ready(out)

    ref = _reference(v, q, wv, bv, wq, bq, wl, bl)
    assert out.shape == (B, K, 1), out.shape
    # bf16 MXU inputs + approx reciprocal -> relaxed tolerances vs the f32 reference.
    assert jnp.allclose(out, ref, atol=2e-2, rtol=2e-2), "mismatch vs JAX reference"
    assert jnp.allclose(jnp.sum(out, axis=1), 1.0, atol=1e-2), "softmax rows must sum to ~1"

    print("KERNEL_OK")
</pallas_src>

<mosaic_0001>
module attributes {stable_mosaic.version = 11 : i64} {
  func.func @kernel(%arg0: i32, %arg1: memref<2x16x16xbf16, #tpu.memory_space<vmem>>, %arg2: memref<2x32xf32, #tpu.memory_space<vmem>>, %arg3: memref<16x32xbf16, #tpu.memory_space<vmem>>, %arg4: memref<1x32xf32, #tpu.memory_space<vmem>>, %arg5: memref<2x16xf32, #tpu.memory_space<vmem>>) attributes {dimension_semantics = [#tpu.dimension_semantics<parallel>], iteration_bounds = array<i64: 1>, scalar_prefetch = 0 : i64, scratch_operands = 0 : i64, tpu.core_type = #tpu.core_type<tc>, window_params = [{transform_indices = @transform_0, window_bounds = array<i64: 2, 16, 16>}, {transform_indices = @transform_1, window_bounds = array<i64: 2, 32>}, {pipeline_mode = #tpu.pipeline_mode<synchronous>, transform_indices = @transform_2, window_bounds = array<i64: 16, 32>}, {pipeline_mode = #tpu.pipeline_mode<synchronous>, transform_indices = @transform_3, window_bounds = array<i64: 1, 32>}, {transform_indices = @transform_4, window_bounds = array<i64: 2, 16>}]} {
    %c0 = arith.constant 0 : index
    %c0_0 = arith.constant 0 : index
    %c0_1 = arith.constant 0 : index
    %0 = vector.load %arg1[%c0, %c0_0, %c0_1] : memref<2x16x16xbf16, #tpu.memory_space<vmem>>, vector<2x16x16xbf16>
    %1 = vector.shape_cast %0 : vector<2x16x16xbf16> to vector<32x16xbf16>
    %c0_2 = arith.constant 0 : index
    %c0_3 = arith.constant 0 : index
    %2 = vector.load %arg3[%c0_2, %c0_3] : memref<16x32xbf16, #tpu.memory_space<vmem>>, vector<16x32xbf16>
    %cst = arith.constant dense<0.000000e+00> : vector<32x32xf32>
    %3 = tpu.matmul %1, %2, %cst {dimension_numbers = #tpu.dot_dimension_numbers<[1], [0], [0], [1], [0, 0, 1, 1], [], []>} : vector<32x16xbf16>, vector<16x32xbf16>, vector<32x32xf32> -> vector<32x32xf32>
    %c0_4 = arith.constant 0 : index
    %c0_5 = arith.constant 0 : index
    %4 = vector.load %arg4[%c0_4, %c0_5] : memref<1x32xf32, #tpu.memory_space<vmem>>, vector<1x32xf32>
    %5 = vector.broadcast %4 : vector<1x32xf32> to vector<32x32xf32>
    %6 = arith.addf %3, %5 : vector<32x32xf32>
    %cst_6 = arith.constant 0.000000e+00 : f32
    %7 = vector.broadcast %cst_6 : f32 to vector<32x32xf32>
    %8 = arith.maximumf %6, %7 : vector<32x32xf32>
    %9 = vector.shape_cast %8 : vector<32x32xf32> to vector<2x16x32xf32>
    %c0_7 = arith.constant 0 : index
    %c0_8 = arith.constant 0 : index
    %10 = vector.load %arg2[%c0_7, %c0_8] : memref<2x32xf32, #tpu.memory_space<vmem>>, vector<2x32xf32>
    %11 = vector.shape_cast %10 : vector<2x32xf32> to vector<2x1x32xf32>
    %12 = vector.broadcast %11 : vector<2x1x32xf32> to vector<2x16x32xf32>
    %13 = arith.mulf %9, %12 : vector<2x16x32xf32>
    %cst_9 = arith.constant dense<0.000000e+00> : vector<2x16xf32>
    %14 = vector.multi_reduction <add>, %13, %cst_9 [2] : vector<2x16x32xf32> to vector<2x16xf32>
    %15 = tpu.iota {dimensions = array<i32: 1>} : vector<2x16xi32>
    %c10_i32 = arith.constant 10 : i32
    %16 = vector.broadcast %c10_i32 : i32 to vector<2x16xi32>
    %17 = arith.cmpi slt, %15, %16 : vector<2x16xi32>
    %cst_10 = arith.constant -1.000000e+30 : f32
    %18 = vector.broadcast %cst_10 : f32 to vector<2x16xf32>
    %19 = arith.select %17, %14, %18 : vector<2x16xi1>, vector<2x16xf32>
    %cst_11 = arith.constant dense<0xFF800000> : vector<2xf32>
    %20 = vector.multi_reduction <maximumf>, %19, %cst_11 [1] : vector<2x16xf32> to vector<2xf32>
    %21 = vector.shape_cast %20 : vector<2xf32> to vector<2x1xf32>
    %22 = vector.broadcast %21 : vector<2x1xf32> to vector<2x16xf32>
    %23 = arith.subf %19, %22 : vector<2x16xf32>
    %24 = math.exp %23 : vector<2x16xf32>
    %cst_12 = arith.constant dense<0.000000e+00> : vector<2xf32>
    %25 = vector.multi_reduction <add>, %24, %cst_12 [1] : vector<2x16xf32> to vector<2xf32>
    %26 = vector.shape_cast %25 : vector<2xf32> to vector<2x1xf32>
    %27 = tpu.reciprocal %26 {approx = true} : vector<2x1xf32> -> vector<2x1xf32>
    %28 = vector.broadcast %27 : vector<2x1xf32> to vector<2x16xf32>
    %29 = arith.mulf %24, %28 : vector<2x16xf32>
    %c0_13 = arith.constant 0 : index
    %c0_14 = arith.constant 0 : index
    %30 = vector.load %arg5[%c0_13, %c0_14] : memref<2x16xf32, #tpu.memory_space<vmem>>, vector<2x16xf32>
    tpu.vector_store %arg5[%c0_13, %c0_14], %29 {strides = array<i32>} : memref<2x16xf32, #tpu.memory_space<vmem>>, vector<2x16xf32>,
    return
  }
  func.func @transform_0(%arg0: i32) -> (i32, i32, i32) {
    %c0_i32 = arith.constant 0 : i32
    %c0_i32_0 = arith.constant 0 : i32
    %c0_i32_1 = arith.constant 0 : i32
    return %arg0, %c0_i32, %c0_i32_0 : i32, i32, i32
  }
  func.func @transform_1(%arg0: i32) -> (i32, i32) {
    %c0_i32 = arith.constant 0 : i32
    %c0_i32_0 = arith.constant 0 : i32
    return %arg0, %c0_i32 : i32, i32
  }
  func.func @transform_2(%arg0: i32) -> (i32, i32) {
    %c0_i32 = arith.constant 0 : i32
    %c0_i32_0 = arith.constant 0 : i32
    %c0_i32_1 = arith.constant 0 : i32
    return %c0_i32, %c0_i32_0 : i32, i32
  }
  func.func @transform_3(%arg0: i32) -> (i32, i32) {
    %c0_i32 = arith.constant 0 : i32
    %c0_i32_0 = arith.constant 0 : i32
    %c0_i32_1 = arith.constant 0 : i32
    return %c0_i32, %c0_i32_0 : i32, i32
  }
  func.func @transform_4(%arg0: i32) -> (i32, i32) {
    %c0_i32 = arith.constant 0 : i32
    %c0_i32_0 = arith.constant 0 : i32
    return %arg0, %c0_i32 : i32, i32
  }
}

module attributes {stable_mosaic.version = 11 : i64} {
  func.func @kernel(%arg0: i32, %arg1: memref<2x16x16xbf16, #tpu.memory_space<vmem>>, %arg2: memref<2x32xf32, #tpu.memory_space<vmem>>, %arg3: memref<16x32xbf16, #tpu.memory_space<vmem>>, %arg4: memref<1x32xf32, #tpu.memory_space<vmem>>, %arg5: memref<2x16xf32, #tpu.memory_space<vmem>>) attributes {dimension_semantics = [#tpu.dimension_semantics<parallel>], iteration_bounds = array<i64: 1>, scalar_prefetch = 0 : i64, scratch_operands = 0 : i64, tpu.core_type = #tpu.core_type<tc>, window_params = [{transform_indices = @transform_0, window_bounds = array<i64: 2, 16, 16>}, {transform_indices = @transform_1, window_bounds = array<i64: 2, 32>}, {pipeline_mode = #tpu.pipeline_mode<synchronous>, transform_indices = @transform_2, window_bounds = array<i64: 16, 32>}, {pipeline_mode = #tpu.pipeline_mode<synchronous>, transform_indices = @transform_3, window_bounds = array<i64: 1, 32>}, {transform_indices = @transform_4, window_bounds = array<i64: 2, 16>}]} {
    %c0 = arith.constant 0 : index
    %c0_0 = arith.constant 0 : index
    %c0_1 = arith.constant 0 : index
    %0 = vector.load %arg1[%c0, %c0_0, %c0_1] : memref<2x16x16xbf16, #tpu.memory_space<vmem>>, vector<2x16x16xbf16>
    %1 = vector.shape_cast %0 : vector<2x16x16xbf16> to vector<32x16xbf16>
    %c0_2 = arith.constant 0 : index
    %c0_3 = arith.constant 0 : index
    %2 = vector.load %arg3[%c0_2, %c0_3] : memref<16x32xbf16, #tpu.memory_space<vmem>>, vector<16x32xbf16>
    %cst = arith.constant dense<0.000000e+00> : vector<32x32xf32>
    %3 = tpu.matmul %1, %2, %cst {dimension_numbers = #tpu.dot_dimension_numbers<[1], [0], [0], [1], [0, 0, 1, 1], [], []>} : vector<32x16xbf16>, vector<16x32xbf16>, vector<32x32xf32> -> vector<32x32xf32>
    %c0_4 = arith.constant 0 : index
    %c0_5 = arith.constant 0 : index
    %4 = vector.load %arg4[%c0_4, %c0_5] : memref<1x32xf32, #tpu.memory_space<vmem>>, vector<1x32xf32>
    %5 = vector.broadcast %4 : vector<1x32xf32> to vector<32x32xf32>
    %6 = arith.addf %3, %5 : vector<32x32xf32>
    %cst_6 = arith.constant 0.000000e+00 : f32
    %7 = vector.broadcast %cst_6 : f32 to vector<32x32xf32>
    %8 = arith.maximumf %6, %7 : vector<32x32xf32>
    %9 = vector.shape_cast %8 : vector<32x32xf32> to vector<2x16x32xf32>
    %c0_7 = arith.constant 0 : index
    %c0_8 = arith.constant 0 : index
    %10 = vector.load %arg2[%c0_7, %c0_8] : memref<2x32xf32, #tpu.memory_space<vmem>>, vector<2x32xf32>
    %11 = vector.shape_cast %10 : vector<2x32xf32> to vector<2x1x32xf32>
    %12 = vector.broadcast %11 : vector<2x1x32xf32> to vector<2x16x32xf32>
    %13 = arith.mulf %9, %12 : vector<2x16x32xf32>
    %cst_9 = arith.constant dense<0.000000e+00> : vector<2x16xf32>
    %14 = vector.multi_reduction <add>, %13, %cst_9 [2] : vector<2x16x32xf32> to vector<2x16xf32>
    %15 = tpu.iota {dimensions = array<i32: 1>} : vector<2x16xi32>
    %c10_i32 = arith.constant 10 : i32
    %16 = vector.broadcast %c10_i32 : i32 to vector<2x16xi32>
    %17 = arith.cmpi slt, %15, %16 : vector<2x16xi32>
    %cst_10 = arith.constant -1.000000e+30 : f32
    %18 = vector.broadcast %cst_10 : f32 to vector<2x16xf32>
    %19 = arith.select %17, %14, %18 : vector<2x16xi1>, vector<2x16xf32>
    %cst_11 = arith.constant dense<0xFF800000> : vector<2xf32>
    %20 = vector.multi_reduction <maximumf>, %19, %cst_11 [1] : vector<2x16xf32> to vector<2xf32>
    %21 = vector.shape_cast %20 : vector<2xf32> to vector<2x1xf32>
    %22 = vector.broadcast %21 : vector<2x1xf32> to vector<2x16xf32>
    %23 = arith.subf %19, %22 : vector<2x16xf32>
    %24 = math.exp %23 : vector<2x16xf32>
    %cst_12 = arith.constant dense<0.000000e+00> : vector<2xf32>
    %25 = vector.multi_reduction <add>, %24, %cst_12 [1] : vector<2x16xf32> to vector<2xf32>
    %26 = vector.shape_cast %25 : vector<2xf32> to vector<2x1xf32>
    %27 = tpu.reciprocal %26 {approx = true} : vector<2x1xf32> -> vector<2x1xf32>
    %28 = vector.broadcast %27 : vector<2x1xf32> to vector<2x16xf32>
    %29 = arith.mulf %24, %28 : vector<2x16xf32>
    %c0_13 = arith.constant 0 : index
    %c0_14 = arith.constant 0 : index
    %30 = vector.load %arg5[%c0_13, %c0_14] : memref<2x16xf32, #tpu.memory_space<vmem>>, vector<2x16xf32>
    tpu.vector_store %arg5[%c0_13, %c0_14], %29 {strides = array<i32>} : memref<2x16xf32, #tpu.memory_space<vmem>>, vector<2x16xf32>,
    return
  }
  func.func @transform_0(%arg0: i32) -> (i32, i32, i32) {
    %c0_i32 = arith.constant 0 : i32
    %c0_i32_0 = arith.constant 0 : i32
    %c0_i32_1 = arith.constant 0 : i32
    return %arg0, %c0_i32, %c0_i32_0 : i32, i32, i32
  }
  func.func @transform_1(%arg0: i32) -> (i32, i32) {
    %c0_i32 = arith.constant 0 : i32
    %c0_i32_0 = arith.constant 0 : i32
    return %arg0, %c0_i32 : i32, i32
  }
  func.func @transform_2(%arg0: i32) -> (i32, i32) {
    %c0_i32 = arith.constant 0 : i32
    %c0_i32_0 = arith.constant 0 : i32
    %c0_i32_1 = arith.constant 0 : i32
    return %c0_i32, %c0_i32_0 : i32, i32
  }
  func.func @transform_3(%arg0: i32) -> (i32, i32) {
    %c0_i32 = arith.constant 0 : i32
    %c0_i32_0 = arith.constant 0 : i32
    %c0_i32_1 = arith.constant 0 : i32
    return %c0_i32, %c0_i32_0 : i32, i32
  }
  func.func @transform_4(%arg0: i32) -> (i32, i32) {
    %c0_i32 = arith.constant 0 : i32
    %c0_i32_0 = arith.constant 0 : i32
    return %arg0, %c0_i32 : i32, i32
  }
}

</mosaic_0001>

<bundles_post_ra>
// kernel: tpu_custom_call.1
= control target key start
LH: loop header
LB: loop body
LE: loop exit
PB: predicated region body
PF: predicated region fallthrough
CT: control target
= control target key end

     0   :  { %9 = vsyncpa [#allocation3], 0  ;;  %s428_s0 = inlined_call_operand.hbm [shape: bf16[2,16,16], index: 0, kind: input, shape index: {}]   ;;  %s429_s1 = inlined_call_operand.hbm [shape: f32[2,32], index: 1, kind: input, shape index: {}]   ;;  %s430_s2 = inlined_call_operand.hbm [shape: bf16[16,32], index: 2, kind: input, shape index: {}]   ;;  %s431_s3 = inlined_call_operand.vmem [shape: f32[1,32], index: 3, kind: input, shape index: {}]   ;;  %s432_s4 = inlined_call_operand.hbm [shape: f32[2,16], index: 4, kind: output, shape index: {}]  }
   0x1   :  { %10 = vsyncpa [#allocation6], 0 }
   0x2   :  { %11 = vsyncpa [#allocation4], 0  ;;  %s374_s15 = smov [#allocation5]   ;;  %s375_s17 = smov [#allocation2]  }
   0x3   :  { %s30_s16 = sshll.u32 %s374_s15, 4  ;;  %s17_s18 = sshll.u32 %s375_s17, 4  ;;  %s31_s16 = int_to_ptr.vmem [resolvable:$true] %s30_s16  ;;  %s18_s18 = int_to_ptr.vmem [resolvable:$true] %s17_s18 }
   0x4   :  { %s296_s19 = scalar_lea.vmem %s31_s16, 32  ;;  %p301_p1 = scmp.lt.s32.totalorder %s31_s16, %s31_s16 }
   0x5   :  { %p297_p0 = scmp.ne.s32.totalorder %s31_s16, %s296_s19  ;;  %p302_p2 = scmp.lt.s32.totalorder %s296_s19, %s296_s19 }
   0x7   :  { %p303_p3 = por %p302_p2, %p301_p1 }
   0x9   :  { %p304_p4 = pnand %p303_p3, %p297_p0 }
   0xb   :  { %307 = shalt.err (!%p304_p4)
}
   0xc   :  { %33 = dma.hbm_to_vmem [thread:$0]  %s429_s1, 32, %s31_s16, [#allocation6]  }
   0xd   :  { %s316_s22 = scalar_lea.vmem %s18_s18, 256  ;;  %p321_p6 = scmp.lt.s32.totalorder %s18_s18, %s18_s18 }
   0xe   :  { %p317_p5 = scmp.ne.s32.totalorder %s18_s18, %s316_s22  ;;  %p322_p7 = scmp.lt.s32.totalorder %s316_s22, %s316_s22 }
  0x10   :  { %p323_p8 = por %p322_p7, %p321_p6 }
  0x12   :  { %p324_p9 = pnand %p323_p8, %p317_p5 }
  0x14   :  { %327 = shalt.err (!%p324_p9)
}
  0x15   :  { %s376_s23 = smov 64   ;;  %s377_s24 = smov 4  }
  0x16   :  { %23 = dma.hbm_to_vmem [thread:$0]  %s428_s0, 256, %s18_s18, [#allocation3], %s376_s23, %s376_s23, %s377_s24  }
  0x17   :  { %s378_s27 = smov [#allocation7]  }
  0x18   :  { %s39_s28 = sshll.u32 %s378_s27, 4  ;;  %s40_s28 = int_to_ptr.vmem [resolvable:$true] %s39_s28 }
  0x19   :  { %s336_s29 = scalar_lea.vmem %s40_s28, 128  ;;  %p341_p11 = scmp.lt.s32.totalorder %s40_s28, %s40_s28 }
  0x1a   :  { %p337_p10 = scmp.ne.s32.totalorder %s40_s28, %s336_s29  ;;  %p342_p12 = scmp.lt.s32.totalorder %s336_s29, %s336_s29 }
  0x1c   :  { %p343_p13 = por %p342_p12, %p341_p11 }
  0x1e   :  { %p344_p0 = pnand %p343_p13, %p337_p10 }
  0x20   :  { %347 = shalt.err (!%p344_p0)
}
  0x21   :  { %45 = dma.hbm_to_vmem [thread:$0]  %s430_s2, 128, %s40_s28, [#allocation6], %s376_s23, %s376_s23, %s377_s24  }
  0x22   :  { %368 = dma.done.wait [#allocation3], 256  }
  0x23   :  { %369 = vsyncadd [#allocation3], 4294967040 }
  0x24   :  { %370 = dma.done.wait [#allocation6], 160  }
  0x25   :  { %371 = vsyncadd [#allocation6], 4294967136  ;;  %v281_v0 = vld [vmem:[#allocation7] sm:$0xff]   ;;  %vm87_vm0 = vcmask 130048   ;;  %v282_v1 = vld [vmem:[#allocation2] sm:$0xff]   ;;  %v160_v5 = vlaneseq  ;;  %vm185_vm1 = vcmask 261120  }
  0x26   :  { %268 = vmatprep.subr.bf16.mxu0 %v281_v0  ;;  %v283_v2 = vld [vmem:[#allocation2 + $0x8] sm:$0xff]   ;;  %270 = vmatprep.mubr.msk.bf16.mxu0 %vm87_vm0, %v282_v1  ;;  %v379_v3 = vmov 1966171168   ;;  %v258_v13 = vld [vmem:[%s431_s3] ss:$0 sm:$0xff]  ;;  %vm214_vm2 = vcmask 130112  }
  0x27   :  { %269 = vmatpush3.bf16.msra.mxu0 %v281_v0  ;;  %v158_v4 = vunpack.c.l.s4 %v379_v3  ;;  %v161_v7 = vshrl.u32 %v160_v5, 7  ;;  %v264_v8 = vld.sshfl [vmem:[#allocation5] sm:$0x11 pattern:$0x75316420]  ;;  %v199_v37 = vand.u32 127, %v160_v5 }
  0x28   :  { %v156_v9 = vcombine.high %v264_v8, %v264_v8  ;;  %vm225_vm3 = vcmask 1041409   ;;  %vm229_vm5 = vcmask 123904   ;;  %s380_s3 = smov [#allocation8]  }
  0x29   :  { %v159_v6 = vunpack.c.0.s8 %v158_v4  ;;  %v173_v12 = vsub.s32 0, %v161_v7  ;;  %v209_v38 = vadd.s32 4294967288, %v199_v37  ;;  %v207_v42 = vsub.s32 %v199_v37, %v161_v7  ;;  %s248_s5 = sshll.u32 %s380_s3, 4  ;;  %s249_s5 = int_to_ptr.vmem [resolvable:$true] %s248_s5 }
  0x2a   :  { %271 = vmatmul.mubr.msk.bf16.vlgmr.msra.gmra.mxu0 %vm87_vm0, %v283_v2  ;;  %vm200_vm4 = vcmp.lt.s32.totalorder %v199_v37, 10  ;;  %s348_s6 = scalar_lea.vmem %s249_s5, 32  ;;  %p353_p2 = scmp.lt.s32.totalorder %s249_s5, %s249_s5 }
  0x2b   :  { %v162_v10 = vsub.s32 %v159_v6, %v161_v7  ;;  %v212_v40 = vsub.s32 %v209_v38, %v161_v7  ;;  %p349_p1 = scmp.ne.s32.totalorder %s249_s5, %s348_s6  ;;  %p354_p3 = scmp.lt.s32.totalorder %s348_s6, %s348_s6 }
  0x2d   :  { %v170_v11 = vrot.slane %v156_v9, %v162_v10  ;;  %v163_v14 = vrot.slane %v264_v8, %v162_v10  ;;  %p355_p4 = por %p354_p3, %p353_p2 }
  0x2f   :  { %v178_v17 = vrot.slane %v170_v11, %v173_v12  ;;  %v174_v21 = vrot.slane %v163_v14, %v173_v12  ;;  %p356_p5 = pnand %p355_p4, %p349_p1 }
  0xea   :  { %v272_v15 = vpop.f32.mrf.mxu0 }
  0xeb   :  { %v137_v16 = vadd.f32 %v272_v15, %v258_v13 }
  0xec   :  { %v128_v18 = vpop.f32.mrf.mxu0 }
  0xed   :  { %v145_v19 = vmax.f32 %v137_v16, 0.0  ;;  %v129_v20 = vadd.f32 %v258_v13, %v128_v18 }
  0xee   :  { %v273_v22 = vpop.f32.mrf.mxu0 }
  0xef   :  { %v143_v23 = vmax.f32 %v129_v20, 0.0  ;;  %v140_v24 = vadd.f32 %v273_v22, %v258_v13  ;;  %v183_v25 = vmul.f32 %v178_v17, %v145_v19 }
  0xf0   :  { %v131_v26 = vpop.f32.mrf.mxu0 }
  0xf1   :  { %v146_v27 = vmax.f32 %v140_v24, 0.0  ;;  %v132_v28 = vadd.f32 %v258_v13, %v131_v26  ;;  %v192_v29 = vsel %vm185_vm1, %v183_v25, 0.0  ;;  %v181_v30 = vmul.f32 %v174_v21, %v143_v23 }
  0xf2   :  { %193 = vadd.xlane.f32.xlu1 %v192_v29 }
  0xf3   :  { %v144_v31 = vmax.f32 %v132_v28, 0.0  ;;  %v186_v32 = vsel %vm185_vm1, %v181_v30, 0.0  ;;  %v184_v33 = vmul.f32 %v178_v17, %v146_v27 }
  0xf4   :  { %187 = vadd.xlane.f32.xlu0 %v186_v32 }
  0xf5   :  { %v195_v34 = vsel %vm185_vm1, %v184_v33, 0.0  ;;  %v182_v35 = vmul.f32 %v174_v21, %v144_v31 }
  0xf6   :  { %196 = vadd.xlane.f32.xlu1 %v195_v34 }
  0xf7   :  { %v189_v36 = vsel %vm185_vm1, %v182_v35, 0.0 }
  0xf8   :  { %190 = vadd.xlane.f32.xlu0 %v189_v36 }
 0x17b   :  { %v194_v39 = vpop.xlane.xlu1 %193 }
 0x17c   :  { %v219_v46 = vrot.slane %v194_v39, %v207_v42 }
 0x17d   :  { %v188_v41 = vpop.xlane.xlu0 %187 }
 0x17e   :  { %v208_v47 = vrot.slane %v188_v41, %v207_v42 }
 0x17f   :  { %v197_v43 = vpop.xlane.xlu1 %196 }
 0x180   :  { %v223_v44 = vrot.slane %v197_v43, %v212_v40 }
 0x181   :  { %v191_v45 = vpop.xlane.xlu0 %190 }
 0x182   :  { %v213_v48 = vrot.slane %v191_v45, %v212_v40  ;;  %v224_v50 = vsel %vm214_vm2, %v223_v44, %v219_v46 }
 0x184   :  { %v215_v49 = vsel %vm214_vm2, %v213_v48, %v208_v47 }
 0x185   :  { %v226_v51 = vsel %vm225_vm3, %v224_v50, %v215_v49 }
 0x186   :  { %v228_v52 = vsel %vm200_vm4, %v226_v51, -1e+30 }
 0x187   :  { %v230_v53 = vsel %vm229_vm5, %v228_v52, -inf }
 0x188   :  { %231 = vmax.xlane.f32.xlu0 %v230_v53 }
 0x211   :  { %v232_v54 = vpop.xlane.xlu0 %231 }
 0x212   :  { %v233_v55 = vsub.f32 %v228_v52, %v232_v54 }
 0x214   :  { %v234_v56 = vmul.f32 1.442695, %v233_v55 }
 0x216   :  { %284 = vpow2.f32 %v234_v56 }
 0x223   :  { %v285_v57 = vpop.eup %284 }
 0x224   :  { %v236_v58 = vsel %vm229_vm5, %v285_v57, 0.0 }
 0x225   :  { %237 = vadd.xlane.f32.xlu1 %v236_v58 }
 0x2ae   :  { %v238_v59 = vpop.xlane.xlu1 %237 }
 0x2af   :  { %286 = vrcp.f32 %v238_v59 }
 0x2bc   :  { %v287_v60 = vpop.eup %286 }
 0x2bd   :  { %v240_v61 = vmul.f32 %v287_v60, %v285_v57 }
 0x2bf   :  { %241 = vst.msk [vmem:[#allocation8] sm:$0x3] %vm229_vm5, %v240_v61 }
 0x2c0   :  { %359 = shalt.err (!%p356_p5)
}
 0x2c1   :  { %251 = dma.vmem_to_hbm [thread:$0]  %s249_s5, 32, %s432_s4, [#allocation4]  }
 0x2c2   :  { %372 = dma.done.wait [#allocation4], 32  }
 0x2c3   :  { %373 = vsyncadd [#allocation4], 4294967264 }
 0x2c4   :  { %255 = vsyncpa [#allocation3], 1 }
 0x2c5   :  { %256 = vsyncpa [#allocation6], 1 }
 0x2c6   :  { %257 = vsyncpa [#allocation4], 1 }

// kernel: tpu_custom_call.1
= control target key start
LH: loop header
LB: loop body
LE: loop exit
PB: predicated region body
PF: predicated region fallthrough
CT: control target
= control target key end

     0   :  { %9 = vsyncpa [#allocation3], 0  ;;  %s428_s0 = inlined_call_operand.hbm [shape: bf16[2,16,16], index: 0, kind: input, shape index: {}]   ;;  %s429_s1 = inlined_call_operand.hbm [shape: f32[2,32], index: 1, kind: input, shape index: {}]   ;;  %s430_s2 = inlined_call_operand.hbm [shape: bf16[16,32], index: 2, kind: input, shape index: {}]   ;;  %s431_s3 = inlined_call_operand.vmem [shape: f32[1,32], index: 3, kind: input, shape index: {}]   ;;  %s432_s4 = inlined_call_operand.hbm [shape: f32[2,16], index: 4, kind: output, shape index: {}]  }
   0x1   :  { %10 = vsyncpa [#allocation6], 0 }
   0x2   :  { %11 = vsyncpa [#allocation4], 0  ;;  %s374_s15 = smov [#allocation5]   ;;  %s375_s17 = smov [#allocation2]  }
   0x3   :  { %s30_s16 = sshll.u32 %s374_s15, 4  ;;  %s17_s18 = sshll.u32 %s375_s17, 4  ;;  %s31_s16 = int_to_ptr.vmem [resolvable:$true] %s30_s16  ;;  %s18_s18 = int_to_ptr.vmem [resolvable:$true] %s17_s18 }
   0x4   :  { %s296_s19 = scalar_lea.vmem %s31_s16, 32  ;;  %p301_p1 = scmp.lt.s32.totalorder %s31_s16, %s31_s16 }
   0x5   :  { %p297_p0 = scmp.ne.s32.totalorder %s31_s16, %s296_s19  ;;  %p302_p2 = scmp.lt.s32.totalorder %s296_s19, %s296_s19 }
   0x7   :  { %p303_p3 = por %p302_p2, %p301_p1 }
   0x9   :  { %p304_p4 = pnand %p303_p3, %p297_p0 }
   0xb   :  { %307 = shalt.err (!%p304_p4)
}
   0xc   :  { %33 = dma.hbm_to_vmem [thread:$0]  %s429_s1, 32, %s31_s16, [#allocation6]  }
   0xd   :  { %s316_s22 = scalar_lea.vmem %s18_s18, 256  ;;  %p321_p6 = scmp.lt.s32.totalorder %s18_s18, %s18_s18 }
   0xe   :  { %p317_p5 = scmp.ne.s32.totalorder %s18_s18, %s316_s22  ;;  %p322_p7 = scmp.lt.s32.totalorder %s316_s22, %s316_s22 }
  0x10   :  { %p323_p8 = por %p322_p7, %p321_p6 }
  0x12   :  { %p324_p9 = pnand %p323_p8, %p317_p5 }
  0x14   :  { %327 = shalt.err (!%p324_p9)
}
  0x15   :  { %s376_s23 = smov 64   ;;  %s377_s24 = smov 4  }
  0x16   :  { %23 = dma.hbm_to_vmem [thread:$0]  %s428_s0, 256, %s18_s18, [#allocation3], %s376_s23, %s376_s23, %s377_s24  }
  0x17   :  { %s378_s27 = smov [#allocation7]  }
  0x18   :  { %s39_s28 = sshll.u32 %s378_s27, 4  ;;  %s40_s28 = int_to_ptr.vmem [resolvable:$true] %s39_s28 }
  0x19   :  { %s336_s29 = scalar_lea.vmem %s40_s28, 128  ;;  %p341_p11 = scmp.lt.s32.totalorder %s40_s28, %s40_s28 }
  0x1a   :  { %p337_p10 = scmp.ne.s32.totalorder %s40_s28, %s336_s29  ;;  %p342_p12 = scmp.lt.s32.totalorder %s336_s29, %s336_s29 }
  0x1c   :  { %p343_p13 = por %p342_p12, %p341_p11 }
  0x1e   :  { %p344_p0 = pnand %p343_p13, %p337_p10 }
  0x20   :  { %347 = shalt.err (!%p344_p0)
}
  0x21   :  { %45 = dma.hbm_to_vmem [thread:$0]  %s430_s2, 128, %s40_s28, [#allocation6], %s376_s23, %s376_s23, %s377_s24  }
  0x22   :  { %368 = dma.done.wait [#allocation3], 256  }
  0x23   :  { %369 = vsyncadd [#allocation3], 4294967040 }
  0x24   :  { %370 = dma.done.wait [#allocation6], 160  }
  0x25   :  { %371 = vsyncadd [#allocation6], 4294967136  ;;  %v281_v0 = vld [vmem:[#allocation7] sm:$0xff]   ;;  %vm87_vm0 = vcmask 130048   ;;  %v282_v1 = vld [vmem:[#allocation2] sm:$0xff]   ;;  %v160_v5 = vlaneseq  ;;  %vm185_vm1 = vcmask 261120  }
  0x26   :  { %268 = vmatprep.subr.bf16.mxu0 %v281_v0  ;;  %v283_v2 = vld [vmem:[#allocation2 + $0x8] sm:$0xff]   ;;  %270 = vmatprep.mubr.msk.bf16.mxu0 %vm87_vm0, %v282_v1  ;;  %v379_v3 = vmov 1966171168   ;;  %v258_v13 = vld [vmem:[%s431_s3] ss:$0 sm:$0xff]  ;;  %vm214_vm2 = vcmask 130112  }
  0x27   :  { %269 = vmatpush3.bf16.msra.mxu0 %v281_v0  ;;  %v158_v4 = vunpack.c.l.s4 %v379_v3  ;;  %v161_v7 = vshrl.u32 %v160_v5, 7  ;;  %v264_v8 = vld.sshfl [vmem:[#allocation5] sm:$0x11 pattern:$0x75316420]  ;;  %v199_v37 = vand.u32 127, %v160_v5 }
  0x28   :  { %v156_v9 = vcombine.high %v264_v8, %v264_v8  ;;  %vm225_vm3 = vcmask 1041409   ;;  %vm229_vm5 = vcmask 123904   ;;  %s380_s3 = smov [#allocation8]  }
  0x29   :  { %v159_v6 = vunpack.c.0.s8 %v158_v4  ;;  %v173_v12 = vsub.s32 0, %v161_v7  ;;  %v209_v38 = vadd.s32 4294967288, %v199_v37  ;;  %v207_v42 = vsub.s32 %v199_v37, %v161_v7  ;;  %s248_s5 = sshll.u32 %s380_s3, 4  ;;  %s249_s5 = int_to_ptr.vmem [resolvable:$true] %s248_s5 }
  0x2a   :  { %271 = vmatmul.mubr.msk.bf16.vlgmr.msra.gmra.mxu0 %vm87_vm0, %v283_v2  ;;  %vm200_vm4 = vcmp.lt.s32.totalorder %v199_v37, 10  ;;  %s348_s6 = scalar_lea.vmem %s249_s5, 32  ;;  %p353_p2 = scmp.lt.s32.totalorder %s249_s5, %s249_s5 }
  0x2b   :  { %v162_v10 = vsub.s32 %v159_v6, %v161_v7  ;;  %v212_v40 = vsub.s32 %v209_v38, %v161_v7  ;;  %p349_p1 = scmp.ne.s32.totalorder %s249_s5, %s348_s6  ;;  %p354_p3 = scmp.lt.s32.totalorder %s348_s6, %s348_s6 }
  0x2d   :  { %v170_v11 = vrot.slane %v156_v9, %v162_v10  ;;  %v163_v14 = vrot.slane %v264_v8, %v162_v10  ;;  %p355_p4 = por %p354_p3, %p353_p2 }
  0x2f   :  { %v178_v17 = vrot.slane %v170_v11, %v173_v12  ;;  %v174_v21 = vrot.slane %v163_v14, %v173_v12  ;;  %p356_p5 = pnand %p355_p4, %p349_p1 }
  0xea   :  { %v272_v15 = vpop.f32.mrf.mxu0 }
  0xeb   :  { %v137_v16 = vadd.f32 %v272_v15, %v258_v13 }
  0xec   :  { %v128_v18 = vpop.f32.mrf.mxu0 }
  0xed   :  { %v145_v19 = vmax.f32 %v137_v16, 0.0  ;;  %v129_v20 = vadd.f32 %v258_v13, %v128_v18 }
  0xee   :  { %v273_v22 = vpop.f32.mrf.mxu0 }
  0xef   :  { %v143_v23 = vmax.f32 %v129_v20, 0.0  ;;  %v140_v24 = vadd.f32 %v273_v22, %v258_v13  ;;  %v183_v25 = vmul.f32 %v178_v17, %v145_v19 }
  0xf0   :  { %v131_v26 = vpop.f32.mrf.mxu0 }
  0xf1   :  { %v146_v27 = vmax.f32 %v140_v24, 0.0  ;;  %v132_v28 = vadd.f32 %v258_v13, %v131_v26  ;;  %v192_v29 = vsel %vm185_vm1, %v183_v25, 0.0  ;;  %v181_v30 = vmul.f32 %v174_v21, %v143_v23 }
  0xf2   :  { %193 = vadd.xlane.f32.xlu1 %v192_v29 }
  0xf3   :  { %v144_v31 = vmax.f32 %v132_v28, 0.0  ;;  %v186_v32 = vsel %vm185_vm1, %v181_v30, 0.0  ;;  %v184_v33 = vmul.f32 %v178_v17, %v146_v27 }
  0xf4   :  { %187 = vadd.xlane.f32.xlu0 %v186_v32 }
  0xf5   :  { %v195_v34 = vsel %vm185_vm1, %v184_v33, 0.0  ;;  %v182_v35 = vmul.f32 %v174_v21, %v144_v31 }
  0xf6   :  { %196 = vadd.xlane.f32.xlu1 %v195_v34 }
  0xf7   :  { %v189_v36 = vsel %vm185_vm1, %v182_v35, 0.0 }
  0xf8   :  { %190 = vadd.xlane.f32.xlu0 %v189_v36 }
 0x17b   :  { %v194_v39 = vpop.xlane.xlu1 %193 }
 0x17c   :  { %v219_v46 = vrot.slane %v194_v39, %v207_v42 }
 0x17d   :  { %v188_v41 = vpop.xlane.xlu0 %187 }
 0x17e   :  { %v208_v47 = vrot.slane %v188_v41, %v207_v42 }
 0x17f   :  { %v197_v43 = vpop.xlane.xlu1 %196 }
 0x180   :  { %v223_v44 = vrot.slane %v197_v43, %v212_v40 }
 0x181   :  { %v191_v45 = vpop.xlane.xlu0 %190 }
 0x182   :  { %v213_v48 = vrot.slane %v191_v45, %v212_v40  ;;  %v224_v50 = vsel %vm214_vm2, %v223_v44, %v219_v46 }
 0x184   :  { %v215_v49 = vsel %vm214_vm2, %v213_v48, %v208_v47 }
 0x185   :  { %v226_v51 = vsel %vm225_vm3, %v224_v50, %v215_v49 }
 0x186   :  { %v228_v52 = vsel %vm200_vm4, %v226_v51, -1e+30 }
 0x187   :  { %v230_v53 = vsel %vm229_vm5, %v228_v52, -inf }
 0x188   :  { %231 = vmax.xlane.f32.xlu0 %v230_v53 }
 0x211   :  { %v232_v54 = vpop.xlane.xlu0 %231 }
 0x212   :  { %v233_v55 = vsub.f32 %v228_v52, %v232_v54 }
 0x214   :  { %v234_v56 = vmul.f32 1.442695, %v233_v55 }
 0x216   :  { %284 = vpow2.f32 %v234_v56 }
 0x223   :  { %v285_v57 = vpop.eup %284 }
 0x224   :  { %v236_v58 = vsel %vm229_vm5, %v285_v57, 0.0 }
 0x225   :  { %237 = vadd.xlane.f32.xlu1 %v236_v58 }
 0x2ae   :  { %v238_v59 = vpop.xlane.xlu1 %237 }
 0x2af   :  { %286 = vrcp.f32 %v238_v59 }
 0x2bc   :  { %v287_v60 = vpop.eup %286 }
 0x2bd   :  { %v240_v61 = vmul.f32 %v287_v60, %v285_v57 }
 0x2bf   :  { %241 = vst.msk [vmem:[#allocation8] sm:$0x3] %vm229_vm5, %v240_v61 }
 0x2c0   :  { %359 = shalt.err (!%p356_p5)
}
 0x2c1   :  { %251 = dma.vmem_to_hbm [thread:$0]  %s249_s5, 32, %s432_s4, [#allocation4]  }
 0x2c2   :  { %372 = dma.done.wait [#allocation4], 32  }
 0x2c3   :  { %373 = vsyncadd [#allocation4], 4294967264 }
 0x2c4   :  { %255 = vsyncpa [#allocation3], 1 }
 0x2c5   :  { %256 = vsyncpa [#allocation6], 1 }
 0x2c6   :  { %257 = vsyncpa [#allocation4], 1 }

</bundles_post_ra>
